<compile_context>
chip_gen: v7x
topology: tpu7x:2x2x1
jax: 0.10.0
libtpu: 0.0.40
codegen_flags: <defaults>
</compile_context>

<pallas_src>
import functools

import jax
import jax.numpy as jnp
from jax.experimental import pallas as pl
from jax.experimental.pallas import tpu as pltpu

HIDDEN1 = 128
HIDDEN2 = 64
LANE = 128
SUBLANE = 8
VMEM_BUDGET = 12 * 1024 * 1024  # per-step working-set target; fits all gens.


def _round_up(n, m):
    return ((n + m - 1) // m) * m


def _block_spec(shape, index_map, buffers=None):
    """BlockSpec with an optional pipeline depth; falls back if unsupported."""
    if buffers is not None:
        try:
            return pl.BlockSpec(shape, index_map, pipeline_mode=pl.Buffered(buffers))
        except Exception:  # older jax without pipeline_mode / pl.Buffered
            pass
    return pl.BlockSpec(shape, index_map)


def _is_megacore():
    # 2 TensorCores share "parallel" grid axes on v4 / v5p / v7x;
    # v5e / v6e run the grid serially on a single TC.
    try:
        kind = jax.devices()[0].device_kind.lower()
    except Exception:
        return False
    return any(tag in kind for tag in ("v4", "v5p", "v7"))


def _default_tm(M, input_size, out_w, megacore):
    """Largest row tile whose working set fits a conservative VMEM budget."""
    # Per-row bytes: f32 x tile (x2 buffers) + f32 out tile (x2 buffers) +
    # f32 h1/h2 intermediates + bf16 recasts of h1/h2.
    per_row = (
        2 * 4 * input_size
        + 2 * 4 * out_w
        + 4 * (HIDDEN1 + HIDDEN2)
        + 2 * (HIDDEN1 + HIDDEN2)
    )
    # Resident operands, charged at worst case (double-buffered bf16 weights,
    # f32 biases) since they are not explicitly single-buffered.
    fixed = 2 * 2 * (input_size * HIDDEN1 + HIDDEN1 * HIDDEN2 + HIDDEN2 * out_w)
    fixed += 2 * 4 * (HIDDEN1 + HIDDEN2 + out_w)

    tm = max(SUBLANE, ((VMEM_BUDGET - fixed) // per_row) // SUBLANE * SUBLANE)
    tm = min(tm, 512)
    if megacore:
        # At least 2 grid steps so both TensorCores get work.
        tm = min(tm, max(SUBLANE, _round_up(pl.cdiv(M, 2), SUBLANE)))
    else:
        # A serial grid gains nothing from splitting a small batch.
        tm = min(tm, _round_up(M, SUBLANE))
    return tm


def dnn_kernel(x_ref, w1_ref, b1_ref, w2_ref, b2_ref, w3_ref, b3_ref, o_ref,
               *, compute_dtype):
    # x arrives as f32 straight from HBM; cast to the MXU compute dtype here
    # (saves the wrapper-side cast's extra HBM round trip).
    x = x_ref[...].astype(compute_dtype)

    # fc1: MXU matmul with f32 accumulation, f32 bias + ReLU on the VPU.
    h1 = jnp.dot(x, w1_ref[...], preferred_element_type=jnp.float32) + b1_ref[...]
    h1 = jnp.maximum(h1, 0.0).astype(compute_dtype)

    # fc2 + ReLU
    h2 = jnp.dot(h1, w2_ref[...], preferred_element_type=jnp.float32) + b2_ref[...]
    h2 = jnp.maximum(h2, 0.0).astype(compute_dtype)

    # fc3 (no activation); store in the output dtype (f32).
    out = jnp.dot(h2, w3_ref[...], preferred_element_type=jnp.float32) + b3_ref[...]
    o_ref[...] = out.astype(o_ref.dtype)


def dnn_forward(x, params, *, tm=None, compute_dtype=jnp.bfloat16):
    """x: (M, input_size) f32. params: (in,out)-layout weights + (1,out) biases.

    Pass compute_dtype=jnp.float32 for torch-like f32 operand semantics; the
    default bf16 keeps the MXU on its fast path (accumulation is always f32).
    """
    M, input_size = x.shape
    w1, b1 = params["w1"], params["b1"]
    w2, b2 = params["w2"], params["b2"]
    w3, b3 = params["w3"], params["b3"]
    output_size = w3.shape[1]

    # Final-layer lane handling: narrow outputs store directly (masked vst is
    # cheap, and padding a tiny output to 128 f32 lanes would 16x-amplify the
    # writeback); wide ragged outputs get a lane-dense multiple-of-128 pad.
    if output_size > LANE and output_size % LANE != 0:
        out_w = _round_up(output_size, LANE)
        w3 = jnp.pad(w3, ((0, 0), (0, out_w - output_size)))
        b3 = jnp.pad(b3, ((0, 0), (0, out_w - output_size)))
    else:
        out_w = output_size

    megacore = _is_megacore()
    if tm is None:
        tm = _default_tm(M, input_size, out_w, megacore)
    n_steps = pl.cdiv(M, tm)

    # Weights ride the MXU in compute_dtype (one-off tiny casts, resident in
    # VMEM across the whole grid); biases and accumulation stay f32.
    w1c, w2c, w3c = (w.astype(compute_dtype) for w in (w1, w2, w3))
    b1f, b2f, b3f = (b.astype(jnp.float32) for b in (b1, b2, b3))

    def resident(a):
        return pl.BlockSpec(a.shape, lambda i: (0,) * a.ndim)

    # Deeper x pipelining on long grids (per-step compute is tiny, so the
    # pipeline is DMA-latency dominated), only if the triple buffer is cheap.
    x_bufs = 3 if (n_steps >= 4 and 3 * tm * input_size * 4 <= 6 * 1024 * 1024) else None

    flops = 2 * M * (input_size * HIDDEN1 + HIDDEN1 * HIDDEN2 + HIDDEN2 * out_w)
    bytes_accessed = (
        x.size * x.dtype.itemsize
        + M * out_w * x.dtype.itemsize
        + sum(a.size * a.dtype.itemsize for a in (w1c, b1f, w2c, b2f, w3c, b3f))
    )

    out = pl.pallas_call(
        functools.partial(dnn_kernel, compute_dtype=compute_dtype),
        out_shape=jax.ShapeDtypeStruct((M, out_w), x.dtype),
        grid_spec=pltpu.PrefetchScalarGridSpec(
            num_scalar_prefetch=0,
            grid=(n_steps,),
            in_specs=[
                _block_spec((tm, input_size), lambda i: (i, 0), buffers=x_bufs),
                resident(w1c), resident(b1f),
                resident(w2c), resident(b2f),
                resident(w3c), resident(b3f),
            ],
            out_specs=pl.BlockSpec((tm, out_w), lambda i: (i, 0)),
        ),
        compiler_params=pltpu.CompilerParams(
            dimension_semantics=("parallel",),
            vmem_limit_bytes=32 * 1024 * 1024,
        ),
        cost_estimate=pl.CostEstimate(
            flops=flops, transcendentals=0, bytes_accessed=bytes_accessed
        ),
    )(x, w1c, b1f, w2c, b2f, w3c, b3f)

    return out if out_w == output_size else out[:, :output_size]


def init_params(key, input_size, output_size):
    # Deterministic synthetic init (Kaiming-uniform-like bounds, same shapes as
    # the PyTorch module). Stored as (in_features, out_features) = torch W.T.
    ks = jax.random.split(key, 6)

    def linear(kw, kb, fan_in, fan_out):
        bound = 1.0 / jnp.sqrt(fan_in)
        w = jax.random.uniform(kw, (fan_in, fan_out), jnp.float32, -bound, bound)
        b = jax.random.uniform(kb, (1, fan_out), jnp.float32, -bound, bound)
        return w, b

    w1, b1 = linear(ks[0], ks[1], input_size, HIDDEN1)
    w2, b2 = linear(ks[2], ks[3], HIDDEN1, HIDDEN2)
    w3, b3 = linear(ks[4], ks[5], HIDDEN2, output_size)
    return {"w1": w1, "b1": b1, "w2": w2, "b2": b2, "w3": w3, "b3": b3}


def reference_forward(x, p, compute_dtype=jnp.float32):
    # Matches the kernel's numerics for a given compute_dtype (operand cast +
    # f32 accumulation); with f32 it is the torch-equivalent forward.
    c = lambda a: a.astype(compute_dtype)
    h1 = jnp.maximum(
        jnp.dot(c(x), c(p["w1"]), preferred_element_type=jnp.float32) + p["b1"], 0.0)
    h2 = jnp.maximum(
        jnp.dot(c(h1), c(p["w2"]), preferred_element_type=jnp.float32) + p["b2"], 0.0)
    return jnp.dot(c(h2), c(p["w3"]), preferred_element_type=jnp.float32) + p["b3"]


if __name__ == "__main__":
    key = jax.random.PRNGKey(0)
    k_x, k_p = jax.random.split(key)

    batch = 16          # small demo shapes
    input_size = 32
    output_size = 8     # narrow output -> unpadded masked store path

    x = jax.random.normal(k_x, (batch, input_size), jnp.float32)
    params = init_params(k_p, input_size, output_size)

    # Default bf16-operand path.
    out = jax.block_until_ready(dnn_forward(x, params))
    assert out.shape == (batch, output_size)
    assert out.dtype == jnp.float32

    ref_bf16 = reference_forward(x, params, compute_dtype=jnp.bfloat16)
    ref_f32 = reference_forward(x, params, compute_dtype=jnp.float32)

    # Tight check vs. a reference with identical bf16-operand / f32-accum math.
    assert jnp.allclose(out, ref_bf16, atol=2e-3, rtol=2e-3), "mismatch vs bf16 reference"
    # Loose check vs. the full-f32 (torch-equivalent) forward: semantics intact.
    assert jnp.allclose(out, ref_f32, atol=2.5e-1, rtol=2.5e-1), "mismatch vs f32 reference"

    # Ragged batch (M not a multiple of tm) exercises the masked last tile.
    out_ragged = jax.block_until_ready(dnn_forward(x[:13], params))
    assert out_ragged.shape == (13, output_size)
    assert jnp.allclose(out_ragged, ref_bf16[:13], atol=2e-3, rtol=2e-3), "ragged mismatch"

    # f32-operand path also runs (loose tolerance: MXU f32 pass count may differ).
    out_f32 = jax.block_until_ready(dnn_forward(x, params, compute_dtype=jnp.float32))
    assert jnp.allclose(out_f32, ref_f32, atol=1e-1, rtol=1e-1), "mismatch on f32 path"

    print("KERNEL_OK")
</pallas_src>

<mosaic_0001>
module attributes {stable_mosaic.version = 11 : i64} {
  func.func @dnn_kernel(%arg0: i32, %arg1: memref<16x32xf32, #tpu.memory_space<vmem>>, %arg2: memref<32x128xbf16, #tpu.memory_space<vmem>>, %arg3: memref<1x128xf32, #tpu.memory_space<vmem>>, %arg4: memref<128x64xbf16, #tpu.memory_space<vmem>>, %arg5: memref<1x64xf32, #tpu.memory_space<vmem>>, %arg6: memref<64x8xbf16, #tpu.memory_space<vmem>>, %arg7: memref<1x8xf32, #tpu.memory_space<vmem>>, %arg8: memref<16x8xf32, #tpu.memory_space<vmem>>) attributes {dimension_semantics = [#tpu.dimension_semantics<parallel>], iteration_bounds = array<i64: 1>, scalar_prefetch = 0 : i64, scratch_operands = 0 : i64, tpu.core_type = #tpu.core_type<tc>, window_params = [{transform_indices = @transform_0, window_bounds = array<i64: 16, 32>}, {pipeline_mode = #tpu.pipeline_mode<synchronous>, transform_indices = @transform_1, window_bounds = array<i64: 32, 128>}, {pipeline_mode = #tpu.pipeline_mode<synchronous>, transform_indices = @transform_2, window_bounds = array<i64: 1, 128>}, {pipeline_mode = #tpu.pipeline_mode<synchronous>, transform_indices = @transform_3, window_bounds = array<i64: 128, 64>}, {pipeline_mode = #tpu.pipeline_mode<synchronous>, transform_indices = @transform_4, window_bounds = array<i64: 1, 64>}, {pipeline_mode = #tpu.pipeline_mode<synchronous>, transform_indices = @transform_5, window_bounds = array<i64: 64, 8>}, {pipeline_mode = #tpu.pipeline_mode<synchronous>, transform_indices = @transform_6, window_bounds = array<i64: 1, 8>}, {transform_indices = @transform_7, window_bounds = array<i64: 16, 8>}]} {
    %c0 = arith.constant 0 : index
    %c0_0 = arith.constant 0 : index
    %0 = vector.load %arg1[%c0, %c0_0] : memref<16x32xf32, #tpu.memory_space<vmem>>, vector<16x32xf32>
    %1 = arith.truncf %0 : vector<16x32xf32> to vector<16x32xbf16>
    %c0_1 = arith.constant 0 : index
    %c0_2 = arith.constant 0 : index
    %2 = vector.load %arg2[%c0_1, %c0_2] : memref<32x128xbf16, #tpu.memory_space<vmem>>, vector<32x128xbf16>
    %cst = arith.constant dense<0.000000e+00> : vector<16x128xf32>
    %3 = tpu.matmul %1, %2, %cst {dimension_numbers = #tpu.dot_dimension_numbers<[1], [0], [0], [1], [0, 0, 1, 1], [], []>} : vector<16x32xbf16>, vector<32x128xbf16>, vector<16x128xf32> -> vector<16x128xf32>
    %c0_3 = arith.constant 0 : index
    %c0_4 = arith.constant 0 : index
    %4 = vector.load %arg3[%c0_3, %c0_4] : memref<1x128xf32, #tpu.memory_space<vmem>>, vector<1x128xf32>
    %5 = vector.broadcast %4 : vector<1x128xf32> to vector<16x128xf32>
    %6 = arith.addf %3, %5 : vector<16x128xf32>
    %cst_5 = arith.constant 0.000000e+00 : f32
    %7 = vector.broadcast %cst_5 : f32 to vector<16x128xf32>
    %8 = arith.maximumf %6, %7 : vector<16x128xf32>
    %9 = arith.truncf %8 : vector<16x128xf32> to vector<16x128xbf16>
    %c0_6 = arith.constant 0 : index
    %c0_7 = arith.constant 0 : index
    %10 = vector.load %arg4[%c0_6, %c0_7] : memref<128x64xbf16, #tpu.memory_space<vmem>>, vector<128x64xbf16>
    %cst_8 = arith.constant dense<0.000000e+00> : vector<16x64xf32>
    %11 = tpu.matmul %9, %10, %cst_8 {dimension_numbers = #tpu.dot_dimension_numbers<[1], [0], [0], [1], [0, 0, 1, 1], [], []>} : vector<16x128xbf16>, vector<128x64xbf16>, vector<16x64xf32> -> vector<16x64xf32>
    %c0_9 = arith.constant 0 : index
    %c0_10 = arith.constant 0 : index
    %12 = vector.load %arg5[%c0_9, %c0_10] : memref<1x64xf32, #tpu.memory_space<vmem>>, vector<1x64xf32>
    %13 = vector.broadcast %12 : vector<1x64xf32> to vector<16x64xf32>
    %14 = arith.addf %11, %13 : vector<16x64xf32>
    %cst_11 = arith.constant 0.000000e+00 : f32
    %15 = vector.broadcast %cst_11 : f32 to vector<16x64xf32>
    %16 = arith.maximumf %14, %15 : vector<16x64xf32>
    %17 = arith.truncf %16 : vector<16x64xf32> to vector<16x64xbf16>
    %c0_12 = arith.constant 0 : index
    %c0_13 = arith.constant 0 : index
    %18 = vector.load %arg6[%c0_12, %c0_13] : memref<64x8xbf16, #tpu.memory_space<vmem>>, vector<64x8xbf16>
    %cst_14 = arith.constant dense<0.000000e+00> : vector<16x8xf32>
    %19 = tpu.matmul %17, %18, %cst_14 {dimension_numbers = #tpu.dot_dimension_numbers<[1], [0], [0], [1], [0, 0, 1, 1], [], []>} : vector<16x64xbf16>, vector<64x8xbf16>, vector<16x8xf32> -> vector<16x8xf32>
    %c0_15 = arith.constant 0 : index
    %c0_16 = arith.constant 0 : index
    %20 = vector.load %arg7[%c0_15, %c0_16] : memref<1x8xf32, #tpu.memory_space<vmem>>, vector<1x8xf32>
    %21 = vector.broadcast %20 : vector<1x8xf32> to vector<16x8xf32>
    %22 = arith.addf %19, %21 : vector<16x8xf32>
    %c0_17 = arith.constant 0 : index
    %c0_18 = arith.constant 0 : index
    %23 = vector.load %arg8[%c0_17, %c0_18] : memref<16x8xf32, #tpu.memory_space<vmem>>, vector<16x8xf32>
    tpu.vector_store %arg8[%c0_17, %c0_18], %22 {strides = array<i32>} : memref<16x8xf32, #tpu.memory_space<vmem>>, vector<16x8xf32>,
    return
  }
  func.func @transform_0(%arg0: i32) -> (i32, i32) {
    %c0_i32 = arith.constant 0 : i32
    %c0_i32_0 = arith.constant 0 : i32
    return %arg0, %c0_i32 : i32, i32
  }
  func.func @transform_1(%arg0: i32) -> (i32, i32) {
    %c0_i32 = arith.constant 0 : i32
    %c0_i32_0 = arith.constant 0 : i32
    %c0_i32_1 = arith.constant 0 : i32
    return %c0_i32, %c0_i32_0 : i32, i32
  }
  func.func @transform_2(%arg0: i32) -> (i32, i32) {
    %c0_i32 = arith.constant 0 : i32
    %c0_i32_0 = arith.constant 0 : i32
    %c0_i32_1 = arith.constant 0 : i32
    return %c0_i32, %c0_i32_0 : i32, i32
  }
  func.func @transform_3(%arg0: i32) -> (i32, i32) {
    %c0_i32 = arith.constant 0 : i32
    %c0_i32_0 = arith.constant 0 : i32
    %c0_i32_1 = arith.constant 0 : i32
    return %c0_i32, %c0_i32_0 : i32, i32
  }
  func.func @transform_4(%arg0: i32) -> (i32, i32) {
    %c0_i32 = arith.constant 0 : i32
    %c0_i32_0 = arith.constant 0 : i32
    %c0_i32_1 = arith.constant 0 : i32
    return %c0_i32, %c0_i32_0 : i32, i32
  }
  func.func @transform_5(%arg0: i32) -> (i32, i32) {
    %c0_i32 = arith.constant 0 : i32
    %c0_i32_0 = arith.constant 0 : i32
    %c0_i32_1 = arith.constant 0 : i32
    return %c0_i32, %c0_i32_0 : i32, i32
  }
  func.func @transform_6(%arg0: i32) -> (i32, i32) {
    %c0_i32 = arith.constant 0 : i32
    %c0_i32_0 = arith.constant 0 : i32
    %c0_i32_1 = arith.constant 0 : i32
    return %c0_i32, %c0_i32_0 : i32, i32
  }
  func.func @transform_7(%arg0: i32) -> (i32, i32) {
    %c0_i32 = arith.constant 0 : i32
    %c0_i32_0 = arith.constant 0 : i32
    return %arg0, %c0_i32 : i32, i32
  }
}

</mosaic_0001>

<bundles_post_ra>
// kernel: tpu_custom_call.1
= control target key start
LH: loop header
LB: loop body
LE: loop exit
PB: predicated region body
PF: predicated region fallthrough
CT: control target
= control target key end

     0   :  { %v399_v0 = vmov 0.0   ;;  %vm400_vm0 = vmmov 0   ;;  %vm53_vm1 = vcmask 261120   ;;  %vm255_vm2 = vcmask 523264   ;;  %s507_s1 = inlined_call_operand.vmem [shape: bf16[32,128], index: 1, kind: input, shape index: {}]   ;;  %s508_s0 = inlined_call_operand.vmem [shape: f32[16,32], index: 0, kind: input, shape index: {}]   ;;  %s509_s3 = inlined_call_operand.vmem [shape: bf16[128,64], index: 3, kind: input, shape index: {}]   ;;  %s510_s5 = inlined_call_operand.vmem [shape: bf16[64,8], index: 5, kind: input, shape index: {}]   ;;  %s511_s2 = inlined_call_operand.vmem [shape: f32[1,128], index: 2, kind: input, shape index: {}]   ;;  %s512_s4 = inlined_call_operand.vmem [shape: f32[1,64], index: 4, kind: input, shape index: {}]   ;;  %s513_s6 = inlined_call_operand.vmem [shape: f32[1,8], index: 6, kind: input, shape index: {}]   ;;  %s514_s7 = inlined_call_operand.vmem [shape: f32[16,8], index: 7, kind: output, shape index: {}]  }
   0x1   :  { %343 = vmatprep.subr.bf16.mxu0 %v399_v0  ;;  %v385_v1 = vld [vmem:[%s507_s1] sm:$0xff]   ;;  %347 = vmatprep.mubr.msk.bf16.mxu0 %vm400_vm0, %v399_v0  ;;  %v386_v2 = vld [vmem:[%s507_s1 + $0x8] sm:$0xff]   ;;  %v389_v8 = vld [vmem:[%s509_s3 + $0x10] sm:$0xff]   ;;  %vm300_vm3 = vcmask 64512  }
   0x2   :  { %351 = vmatprep.subr.bf16.mxu1 %v399_v0  ;;  %367 = vmatprep.mubr.msk.bf16.mxu1 %vm400_vm0, %v399_v0  ;;  %v27_v3 = vld [vmem:[%s508_s0] sm:$0xff]  ;;  %v28_v4 = vld [vmem:[%s508_s0 + $0x8] sm:$0xff]  ;;  %v390_v9 = vld [vmem:[%s509_s3 + $0x18] sm:$0xff]  }
   0x3   :  { %344 = vmatpush3.bf16.msra.mxu0 %v385_v1  ;;  %v387_v5 = vld [vmem:[%s509_s3] sm:$0xff]   ;;  %v29_v6 = vpack.c.bf16 %v28_v4, %v27_v3  ;;  %v388_v7 = vld [vmem:[%s509_s3 + $0x8] sm:$0xff]   ;;  %v393_v12 = vld [vmem:[%s509_s3 + $0x30] sm:$0xff]  }
   0x4   :  { %345 = vmatprep.subr.bf16.mxu0 %v399_v0  ;;  %352 = vmatpush3.bf16.msra.mxu1 %v387_v5  ;;  %v391_v10 = vld [vmem:[%s509_s3 + $0x20] sm:$0xff]   ;;  %v392_v11 = vld [vmem:[%s509_s3 + $0x28] sm:$0xff]   ;;  %v394_v13 = vld [vmem:[%s509_s3 + $0x38] sm:$0xff]  }
   0x5   :  { %353 = vmatprep.subr.bf16.mxu1 %v399_v0  ;;  %v395_v14 = vld [vmem:[%s510_s5] sm:$0xff]   ;;  %v396_v15 = vld [vmem:[%s510_s5 + $0x8] sm:$0xff]   ;;  %v397_v26 = vld [vmem:[%s510_s5 + $0x10] sm:$0xff]  }
   0x6   :  { %v307_v16 = vld [vmem:[%s511_s2] ss:$0 sm:$0xff]  ;;  %v398_v27 = vld [vmem:[%s510_s5 + $0x18] sm:$0xff]  }
   0x7   :  { %346 = vmatpush3.bf16.msra.mxu0 %v386_v2  ;;  %v311_v28 = vld [vmem:[%s512_s4] ss:$0 sm:$0xff] }
   0x8   :  { %371 = vmatprep.subr.bf16.mxu0 %v399_v0  ;;  %354 = vmatpush3.bf16.msra.mxu1 %v388_v7  ;;  %v320_v38 = vld [vmem:[%s513_s6] ss:$0 sm:$0xff] }
   0x9   :  { %355 = vmatprep.subr.bf16.mxu1 %v399_v0 }
   0xa   :  { %348 = vmatmul.mubr.msk.bf16.vlgmr.msra.gmra.mrb[0].mxu0 %vm53_vm1, %v29_v6 }
   0xb   :  { %379 = vmatprep.mubr.msk.bf16.mxu0 %vm400_vm0, %v399_v0  ;;  %372 = vmatpush3.bf16.msra.mxu0 %v395_v14 }
   0xc   :  { %356 = vmatpush3.bf16.msra.mxu1 %v389_v8  ;;  %373 = vmatprep.subr.bf16.mxu0 %v399_v0 }
   0xd   :  { %357 = vmatprep.subr.bf16.mxu1 %v399_v0 }
   0xf   :  { %374 = vmatpush3.bf16.msra.mxu0 %v396_v15 }
  0x10   :  { %358 = vmatpush3.bf16.msra.mxu1 %v390_v9  ;;  %375 = vmatprep.subr.bf16.mxu0 %v399_v0 }
  0x11   :  { %359 = vmatprep.subr.bf16.mxu1 %v399_v0 }
  0x13   :  { %376 = vmatpush3.bf16.msra.mxu0 %v397_v26 }
  0x14   :  { %360 = vmatpush3.bf16.msra.mxu1 %v391_v10  ;;  %377 = vmatprep.subr.bf16.mxu0 %v399_v0 }
  0x15   :  { %361 = vmatprep.subr.bf16.mxu1 %v399_v0 }
  0x17   :  { %378 = vmatpush3.bf16.msra.mxu0 %v398_v27 }
  0x18   :  { %362 = vmatpush3.bf16.msra.mxu1 %v392_v11 }
  0x19   :  { %363 = vmatprep.subr.bf16.mxu1 %v399_v0 }
  0x1c   :  { %364 = vmatpush3.bf16.msra.mxu1 %v393_v12 }
  0x1d   :  { %365 = vmatprep.subr.bf16.mxu1 %v399_v0 }
  0x20   :  { %366 = vmatpush3.bf16.msra.mxu1 %v394_v13 }
  0xdd   :  { %v91_v17 = vpop.f32.mrb[0].mxu0 }
  0xde   :  { %v92_v18 = vadd.f32 %v307_v16, %v91_v17  ;;  %v349_v19 = vpop.f32.mrb[1].mxu0 }
  0xdf   :  { %v94_v20 = vpop.f32.mrb[2].mxu0 }
  0xe0   :  { %v95_v21 = vadd.f32 %v307_v16, %v94_v20  ;;  %v350_v22 = vpop.f32.mrb[3].mxu0  ;;  %v98_v23 = vmax.f32 %v92_v18, 0.0 }
  0xe2   :  { %v99_v24 = vmax.f32 %v95_v21, 0.0 }
  0xe4   :  { %v100_v25 = vpack.c.bf16 %v99_v24, %v98_v23 }
  0xe6   :  { %368 = vmatmul.mubr.bf16.vlgmr.msra.gmra.mrb[0].mxu1 %v100_v25 }
 0x1b9   :  { %v206_v29 = vpop.f32.mrb[0].mxu1 }
 0x1ba   :  { %v207_v30 = vadd.f32 %v311_v28, %v206_v29  ;;  %v369_v31 = vpop.f32.mrb[1].mxu1 }
 0x1bb   :  { %v209_v32 = vpop.f32.mrb[2].mxu1 }
 0x1bc   :  { %v210_v33 = vadd.f32 %v311_v28, %v209_v32  ;;  %v370_v34 = vpop.f32.mrb[3].mxu1  ;;  %v213_v35 = vmax.f32 %v207_v30, 0.0 }
 0x1be   :  { %v214_v36 = vmax.f32 %v210_v33, 0.0 }
 0x1c0   :  { %v215_v37 = vpack.c.bf16 %v214_v36, %v213_v35 }
 0x1c2   :  { %380 = vmatmul.mubr.msk.bf16.vlgmr.msra.gmra.mrb[4].mxu0 %vm255_vm2, %v215_v37 }
 0x295   :  { %v293_v39 = vpop.f32.mrb[4].mxu0 }
 0x296   :  { %v294_v40 = vadd.f32 %v320_v38, %v293_v39  ;;  %v381_v41 = vpop.f32.mrb[5].mxu0 }
 0x297   :  { %v296_v42 = vpop.f32.mrb[6].mxu0 }
 0x298   :  { %301 = vst.msk [vmem:[%s514_s7] sm:$0xff] %vm300_vm3, %v294_v40  ;;  %v297_v43 = vadd.f32 %v320_v38, %v296_v42  ;;  %v382_v44 = vpop.f32.mrb[7].mxu0 }
 0x29a   :  { %302 = vst.msk [vmem:[%s514_s7 + $0x8] sm:$0xff] %vm300_vm3, %v297_v43 }

</bundles_post_ra>
